<compile_context>
chip_gen: v7x
topology: tpu7x:2x2x1
jax: 0.10.0
libtpu: 0.0.40
codegen_flags: <defaults>
</compile_context>

<pallas_src>
import jax
import jax.numpy as jnp
from jax.experimental import pallas as pl
from jax.experimental.pallas import tpu as pltpu


# ----------------------------------------------------------------------------- kernel
def fc_net_kernel(x_ref, w0_ref, w1_ref, w2_ref, w3_ref, b3_ref, o_ref):
    """Fused MLP + log_softmax on one (TB, 784) batch tile."""
    x = x_ref[...]  # (TB, 784) f32

    # 784->4 matmul: f32 operands, f32 accumulation on the MXU.
    h = jnp.dot(x, w0_ref[...], preferred_element_type=jnp.float32)
    h = jnp.maximum(h, 0.0)

    h = jnp.dot(h, w1_ref[...], preferred_element_type=jnp.float32)
    h = jnp.maximum(h, 0.0)

    h = jnp.dot(h, w2_ref[...], preferred_element_type=jnp.float32)
    h = jnp.maximum(h, 0.0)

    logits = jnp.dot(h, w3_ref[...], preferred_element_type=jnp.float32)
    logits = logits + b3_ref[...]  # (1, 10) broadcasts over tile rows

    # log_softmax over the class dimension (PyTorch F.log_softmax default dim=1).
    m = jnp.max(logits, axis=-1, keepdims=True)
    shifted = logits - m
    lse = jnp.log(jnp.sum(jnp.exp(shifted), axis=-1, keepdims=True))
    o_ref[...] = shifted - lse


# ----------------------------------------------------------------------------- wrapper
def _round_up(n, m):
    return ((n + m - 1) // m) * m


def _choose_tb(B, tb_max):
    """Batch-tile rows.

    * multiple of 8 (f32 sublane packing),
    * roughly ceil(B/2) so the 'parallel' grid has >= 2 steps whenever the batch
      allows it (keeps both v7x TensorCores busy),
    * capped at tb_max so the double-buffered f32 (TB, 896-lane-padded) input
      block stays well inside the scoped-VMEM limit on every chip.
    """
    half = -(-B // 2)  # cdiv(B, 2)
    tb = min(tb_max, _round_up(half, 8))
    return max(8, tb)


def fc_net_forward(x_nchw, params, *, tb_max=2048, min_pallas_batch=256):
    """x_nchw: (B, 1, 28, 28). Returns (B, 10) f32 log-probabilities."""
    w0, w1, w2, w3, b3 = params
    B = x_nchw.shape[0]

    # Microscopic batches: fixed pallas_call overhead dominates -> plain XLA path.
    if B < min_pallas_batch:
        return fc_net_reference(x_nchw, params)

    # view(-1, 784, 1) -> (B, 784).  Row-major reshape; no extra HBM pass.
    x2d = x_nchw.reshape(B, 28 * 28)
    if x2d.dtype != jnp.float32:
        x2d = x2d.astype(jnp.float32)

    TB = _choose_tb(B, tb_max)

    if B < TB:
        # Tiny batch forced onto the Pallas path: pad up to one aligned tile.
        x_in = jnp.pad(x2d, ((0, TB - B), (0, 0)))
        n_rows = TB
    else:
        # No padding: Pallas masks the ragged edge block (loads padded,
        # out-of-bounds stores dropped; rows are independent so this is safe).
        x_in = x2d
        n_rows = B

    grid = (pl.cdiv(n_rows, TB),)

    cost = pl.CostEstimate(
        flops=2 * n_rows * (784 * 4 + 4 * 4 + 4 * 4 + 4 * 10),
        transcendentals=11 * n_rows,  # 10 exp + 1 log per row
        bytes_accessed=n_rows * 784 * 4 + n_rows * 10 * 4
        + (784 * 4 + 4 * 4 + 4 * 4 + 4 * 10 + 10) * 4,
    )

    const2d = lambda i: (0, 0)  # weights / bias stay VMEM-resident across steps

    out = pl.pallas_call(
        fc_net_kernel,
        out_shape=jax.ShapeDtypeStruct((n_rows, 10), jnp.float32),
        grid=grid,
        in_specs=[
            pl.BlockSpec((TB, 28 * 28), lambda i: (i, 0)),  # x tile (pipelined)
            pl.BlockSpec((28 * 28, 4), const2d),            # w0
            pl.BlockSpec((4, 4), const2d),                  # w1
            pl.BlockSpec((4, 4), const2d),                  # w2
            pl.BlockSpec((4, 10), const2d),                 # w3
            pl.BlockSpec((1, 10), const2d),                 # b3
        ],
        out_specs=pl.BlockSpec((TB, 10), lambda i: (i, 0)),
        compiler_params=pltpu.CompilerParams(
            dimension_semantics=("parallel",),
            vmem_limit_bytes=32 * 1024 * 1024,
        ),
        cost_estimate=cost,
    )(x_in, w0, w1, w2, w3, b3)

    return out[:B] if n_rows != B else out


# ----------------------------------------------------------------------------- init / reference
def init_params(key, layer_sizes=(784, 4, 4, 4, 10)):
    """Deterministic init mimicking PyTorch Conv1d default (uniform +-1/sqrt(fan_in)).

    Weights stored as (in_features, out_features) so the kernel computes x @ W.
    """
    keys = jax.random.split(key, 5)
    params = []
    for i in range(3):  # fc0..fc2 (no bias)
        fan_in = layer_sizes[i]
        bound = 1.0 / jnp.sqrt(fan_in)
        w = jax.random.uniform(
            keys[i], (layer_sizes[i], layer_sizes[i + 1]),
            minval=-bound, maxval=bound, dtype=jnp.float32)
        params.append(w)
    fan_in = layer_sizes[-2]
    bound = 1.0 / jnp.sqrt(fan_in)
    w3 = jax.random.uniform(
        keys[3], (layer_sizes[-2], layer_sizes[-1]),
        minval=-bound, maxval=bound, dtype=jnp.float32)
    b3 = jax.random.uniform(
        keys[4], (1, layer_sizes[-1]),
        minval=-bound, maxval=bound, dtype=jnp.float32)
    params.append(w3)
    params.append(b3)
    return tuple(params)


def fc_net_reference(x_nchw, params):
    """Pure-JAX f32 reference for correctness checking (and tiny-batch fast path)."""
    w0, w1, w2, w3, b3 = params
    B = x_nchw.shape[0]
    x = x_nchw.reshape(B, 28 * 28).astype(jnp.float32)
    h = jnp.maximum(x @ w0, 0.0)
    h = jnp.maximum(h @ w1, 0.0)
    h = jnp.maximum(h @ w2, 0.0)
    logits = h @ w3 + b3
    return jax.nn.log_softmax(logits, axis=-1)


# ----------------------------------------------------------------------------- demo / test
if __name__ == "__main__":
    key = jax.random.PRNGKey(0)
    k_x, k_p = jax.random.split(key)
    params = init_params(k_p)

    # Small demo batch (MNIST-like NCHW).  min_pallas_batch=0 forces the Pallas
    # kernel path even though such a tiny batch would normally take the
    # pure-JAX fast path.
    B = 2
    x = jax.random.normal(k_x, (B, 1, 28, 28), dtype=jnp.float32)
    fwd_small = jax.jit(lambda a: fc_net_forward(a, params, min_pallas_batch=0))
    out = jax.block_until_ready(fwd_small(x))

    ref = fc_net_reference(x, params)
    assert out.shape == (B, 10)
    assert jnp.allclose(out, ref, atol=1e-2, rtol=1e-2), "mismatch vs reference (B=2)"
    assert jnp.allclose(jnp.sum(jnp.exp(out), axis=-1), 1.0, atol=1e-3)

    # Larger batch that is not a multiple of the tile: exercises the 2-step
    # 'parallel' grid and the masked ragged edge block (no batch padding).
    B2 = 300
    x2 = jax.random.normal(k_x, (B2, 1, 28, 28), dtype=jnp.float32)
    fwd_big = jax.jit(lambda a: fc_net_forward(a, params))
    out2 = jax.block_until_ready(fwd_big(x2))

    ref2 = fc_net_reference(x2, params)
    assert out2.shape == (B2, 10)
    assert jnp.allclose(out2, ref2, atol=1e-2, rtol=1e-2), "mismatch vs reference (B=300)"
    assert jnp.allclose(jnp.sum(jnp.exp(out2), axis=-1), 1.0, atol=1e-3)

    print("KERNEL_OK")
</pallas_src>

<mosaic_0001>
module attributes {stable_mosaic.version = 11 : i64} {
  func.func @fc_net_kernel(%arg0: i32, %arg1: memref<8x784xf32, #tpu.memory_space<vmem>>, %arg2: memref<784x4xf32, #tpu.memory_space<vmem>>, %arg3: memref<4x4xf32, #tpu.memory_space<vmem>>, %arg4: memref<4x4xf32, #tpu.memory_space<vmem>>, %arg5: memref<4x10xf32, #tpu.memory_space<vmem>>, %arg6: memref<1x10xf32, #tpu.memory_space<vmem>>, %arg7: memref<8x10xf32, #tpu.memory_space<vmem>>) attributes {dimension_semantics = [#tpu.dimension_semantics<parallel>], iteration_bounds = array<i64: 1>, scalar_prefetch = 0 : i64, scratch_operands = 0 : i64, tpu.core_type = #tpu.core_type<tc>, window_params = [{transform_indices = @transform_0, window_bounds = array<i64: 8, 784>}, {pipeline_mode = #tpu.pipeline_mode<synchronous>, transform_indices = @transform_1, window_bounds = array<i64: 784, 4>}, {pipeline_mode = #tpu.pipeline_mode<synchronous>, transform_indices = @transform_2, window_bounds = array<i64: 4, 4>}, {pipeline_mode = #tpu.pipeline_mode<synchronous>, transform_indices = @transform_3, window_bounds = array<i64: 4, 4>}, {pipeline_mode = #tpu.pipeline_mode<synchronous>, transform_indices = @transform_4, window_bounds = array<i64: 4, 10>}, {pipeline_mode = #tpu.pipeline_mode<synchronous>, transform_indices = @transform_5, window_bounds = array<i64: 1, 10>}, {transform_indices = @transform_6, window_bounds = array<i64: 8, 10>}]} {
    %c0 = arith.constant 0 : index
    %c0_0 = arith.constant 0 : index
    %0 = vector.load %arg1[%c0, %c0_0] : memref<8x784xf32, #tpu.memory_space<vmem>>, vector<8x784xf32>
    %c0_1 = arith.constant 0 : index
    %c0_2 = arith.constant 0 : index
    %1 = vector.load %arg2[%c0_1, %c0_2] : memref<784x4xf32, #tpu.memory_space<vmem>>, vector<784x4xf32>
    %cst = arith.constant dense<0.000000e+00> : vector<8x4xf32>
    %2 = tpu.matmul %0, %1, %cst {dimension_numbers = #tpu.dot_dimension_numbers<[1], [0], [0], [1], [0, 0, 1, 1], [], []>} : vector<8x784xf32>, vector<784x4xf32>, vector<8x4xf32> -> vector<8x4xf32>
    %cst_3 = arith.constant 0.000000e+00 : f32
    %3 = vector.broadcast %cst_3 : f32 to vector<8x4xf32>
    %4 = arith.maximumf %2, %3 : vector<8x4xf32>
    %c0_4 = arith.constant 0 : index
    %c0_5 = arith.constant 0 : index
    %5 = vector.load %arg3[%c0_4, %c0_5] : memref<4x4xf32, #tpu.memory_space<vmem>>, vector<4x4xf32>
    %cst_6 = arith.constant dense<0.000000e+00> : vector<8x4xf32>
    %6 = tpu.matmul %4, %5, %cst_6 {dimension_numbers = #tpu.dot_dimension_numbers<[1], [0], [0], [1], [0, 0, 1, 1], [], []>} : vector<8x4xf32>, vector<4x4xf32>, vector<8x4xf32> -> vector<8x4xf32>
    %cst_7 = arith.constant 0.000000e+00 : f32
    %7 = vector.broadcast %cst_7 : f32 to vector<8x4xf32>
    %8 = arith.maximumf %6, %7 : vector<8x4xf32>
    %c0_8 = arith.constant 0 : index
    %c0_9 = arith.constant 0 : index
    %9 = vector.load %arg4[%c0_8, %c0_9] : memref<4x4xf32, #tpu.memory_space<vmem>>, vector<4x4xf32>
    %cst_10 = arith.constant dense<0.000000e+00> : vector<8x4xf32>
    %10 = tpu.matmul %8, %9, %cst_10 {dimension_numbers = #tpu.dot_dimension_numbers<[1], [0], [0], [1], [0, 0, 1, 1], [], []>} : vector<8x4xf32>, vector<4x4xf32>, vector<8x4xf32> -> vector<8x4xf32>
    %cst_11 = arith.constant 0.000000e+00 : f32
    %11 = vector.broadcast %cst_11 : f32 to vector<8x4xf32>
    %12 = arith.maximumf %10, %11 : vector<8x4xf32>
    %c0_12 = arith.constant 0 : index
    %c0_13 = arith.constant 0 : index
    %13 = vector.load %arg5[%c0_12, %c0_13] : memref<4x10xf32, #tpu.memory_space<vmem>>, vector<4x10xf32>
    %cst_14 = arith.constant dense<0.000000e+00> : vector<8x10xf32>
    %14 = tpu.matmul %12, %13, %cst_14 {dimension_numbers = #tpu.dot_dimension_numbers<[1], [0], [0], [1], [0, 0, 1, 1], [], []>} : vector<8x4xf32>, vector<4x10xf32>, vector<8x10xf32> -> vector<8x10xf32>
    %c0_15 = arith.constant 0 : index
    %c0_16 = arith.constant 0 : index
    %15 = vector.load %arg6[%c0_15, %c0_16] : memref<1x10xf32, #tpu.memory_space<vmem>>, vector<1x10xf32>
    %16 = vector.broadcast %15 : vector<1x10xf32> to vector<8x10xf32>
    %17 = arith.addf %14, %16 : vector<8x10xf32>
    %cst_17 = arith.constant dense<0xFF800000> : vector<8xf32>
    %18 = vector.multi_reduction <maximumf>, %17, %cst_17 [1] : vector<8x10xf32> to vector<8xf32>
    %19 = vector.shape_cast %18 : vector<8xf32> to vector<8x1xf32>
    %20 = vector.broadcast %19 : vector<8x1xf32> to vector<8x10xf32>
    %21 = arith.subf %17, %20 : vector<8x10xf32>
    %22 = math.exp %21 : vector<8x10xf32>
    %cst_18 = arith.constant dense<0.000000e+00> : vector<8xf32>
    %23 = vector.multi_reduction <add>, %22, %cst_18 [1] : vector<8x10xf32> to vector<8xf32>
    %24 = vector.shape_cast %23 : vector<8xf32> to vector<8x1xf32>
    %25 = math.log %24 : vector<8x1xf32>
    %26 = vector.broadcast %25 : vector<8x1xf32> to vector<8x10xf32>
    %27 = arith.subf %21, %26 : vector<8x10xf32>
    %c0_19 = arith.constant 0 : index
    %c0_20 = arith.constant 0 : index
    %28 = vector.load %arg7[%c0_19, %c0_20] : memref<8x10xf32, #tpu.memory_space<vmem>>, vector<8x10xf32>
    tpu.vector_store %arg7[%c0_19, %c0_20], %27 {strides = array<i32>} : memref<8x10xf32, #tpu.memory_space<vmem>>, vector<8x10xf32>,
    return
  }
  func.func @transform_0(%arg0: i32) -> (i32, i32) {
    %c0_i32 = arith.constant 0 : i32
    %c0_i32_0 = arith.constant 0 : i32
    return %arg0, %c0_i32 : i32, i32
  }
  func.func @transform_1(%arg0: i32) -> (i32, i32) {
    %c0_i32 = arith.constant 0 : i32
    %c0_i32_0 = arith.constant 0 : i32
    %c0_i32_1 = arith.constant 0 : i32
    return %c0_i32, %c0_i32_0 : i32, i32
  }
  func.func @transform_2(%arg0: i32) -> (i32, i32) {
    %c0_i32 = arith.constant 0 : i32
    %c0_i32_0 = arith.constant 0 : i32
    %c0_i32_1 = arith.constant 0 : i32
    return %c0_i32, %c0_i32_0 : i32, i32
  }
  func.func @transform_3(%arg0: i32) -> (i32, i32) {
    %c0_i32 = arith.constant 0 : i32
    %c0_i32_0 = arith.constant 0 : i32
    %c0_i32_1 = arith.constant 0 : i32
    return %c0_i32, %c0_i32_0 : i32, i32
  }
  func.func @transform_4(%arg0: i32) -> (i32, i32) {
    %c0_i32 = arith.constant 0 : i32
    %c0_i32_0 = arith.constant 0 : i32
    %c0_i32_1 = arith.constant 0 : i32
    return %c0_i32, %c0_i32_0 : i32, i32
  }
  func.func @transform_5(%arg0: i32) -> (i32, i32) {
    %c0_i32 = arith.constant 0 : i32
    %c0_i32_0 = arith.constant 0 : i32
    %c0_i32_1 = arith.constant 0 : i32
    return %c0_i32, %c0_i32_0 : i32, i32
  }
  func.func @transform_6(%arg0: i32) -> (i32, i32) {
    %c0_i32 = arith.constant 0 : i32
    %c0_i32_0 = arith.constant 0 : i32
    return %arg0, %c0_i32 : i32, i32
  }
}

</mosaic_0001>

<bundles_post_ra>
// kernel: _lambda_.1
= control target key start
LH: loop header
LB: loop body
LE: loop exit
PB: predicated region body
PF: predicated region fallthrough
CT: control target
= control target key end

     0   :  { %11 = vsyncpa [#allocation3], 0  ;;  %s965_s21 = smov [#allocation2]   ;;  %s1074_s0 = inlined_call_operand.vmem [shape: f32[8,784], index: 0, kind: input, shape index: {}]   ;;  %s1075_s1 = inlined_call_operand.hbm [shape: f32[784,4], index: 1, kind: input, shape index: {}]   ;;  %s1076_s2 = inlined_call_operand.vmem [shape: f32[4,4], index: 2, kind: input, shape index: {}]   ;;  %s1077_s3 = inlined_call_operand.vmem [shape: f32[4,4], index: 3, kind: input, shape index: {}]   ;;  %s1078_s4 = inlined_call_operand.vmem [shape: f32[4,10], index: 4, kind: input, shape index: {}]   ;;  %s1079_s5 = inlined_call_operand.vmem [shape: f32[1,10], index: 5, kind: input, shape index: {}]   ;;  %s1080_s6 = inlined_call_operand.vmem [shape: f32[8,10], index: 6, kind: output, shape index: {}]  }
   0x1   :  { %s19_s22 = sshll.u32 %s965_s21, 4  ;;  %s941_s25 = scalar_lea.hbm %s1075_s1, 12544  ;;  %s20_s22 = int_to_ptr.vmem [resolvable:$true] %s19_s22 }
   0x2   :  { %p942_p0 = scmp.ne.s32.totalorder %s1075_s1, %s941_s25  ;;  %p945_p1 = scmp.lt.u32.totalorder %s941_s25, %s1075_s1 }
   0x4   :  { %p947_p2 = pnand %p945_p1, %p942_p0 }
   0x6   :  { %950 = shalt.err (!%p947_p2)
}
   0x7   :  { %s951_s30 = scalar_lea.vmem %s20_s22, 12544  ;;  %p956_p4 = scmp.lt.s32.totalorder %s20_s22, %s20_s22 }
   0x8   :  { %p952_p3 = scmp.ne.s32.totalorder %s20_s22, %s951_s30  ;;  %p957_p5 = scmp.lt.s32.totalorder %s951_s30, %s951_s30 }
   0xa   :  { %p958_p6 = por %p957_p5, %p956_p4 }
   0xc   :  { %p959_p7 = pnand %p958_p6, %p952_p3 }
   0xe   :  { %962 = shalt.err (!%p959_p7)
}
   0xf   :  { %s966_s7 = smov 128   ;;  %s967_s8 = smov 8  }
  0x10   :  { %25 = dma.hbm_to_vmem [thread:$0]  %s1075_s1, 12544, %s20_s22, [#allocation3], %s966_s7, %s966_s7, %s967_s8  }
  0x11   :  { %963 = dma.done.wait [#allocation3], 12544  }
  0x12   :  { %964 = vsyncadd [#allocation3], 4294954752  ;;  %v60_v0 = vld [vmem:[#allocation2 + $0x80] sm:$0xff]  ;;  %v61_v1 = vld [vmem:[#allocation2 + $0x88] sm:$0xff]  ;;  %vm969_vm0 = vmmov 0   ;;  %vm142_vm1 = vcmask 130048  }
  0x13   :  { %v92_v2 = vld [vmem:[#allocation2 + $0x180] sm:$0xff]  ;;  %v832_v3 = vpack.c.bf16 %v61_v1, %v60_v0  ;;  %v93_v4 = vld [vmem:[#allocation2 + $0x188] sm:$0xff]  ;;  %v62_v11 = vld [vmem:[#allocation2 + $0x90] sm:$0xff]  ;;  %vm432_vm2 = vcmask 1043456   ;;  %vm428_vm3 = vcmask 31744   ;;  %vm669_vm4 = vcmask 80896  }
  0x14   :  { %v44_v5 = vld [vmem:[#allocation2] sm:$0xff]  ;;  %v45_v6 = vld [vmem:[#allocation2 + $0x8] sm:$0xff]  ;;  %v864_v7 = vpack.c.bf16 %v93_v4, %v92_v2  ;;  %v63_v13 = vld [vmem:[#allocation2 + $0x98] sm:$0xff] }
  0x15   :  { %v834_v8 = vpack.c.bf16 %v45_v6, %v44_v5  ;;  %v76_v9 = vld [vmem:[#allocation2 + $0x100] sm:$0xff]  ;;  %v77_v10 = vld [vmem:[#allocation2 + $0x108] sm:$0xff]  ;;  %833 = vmatprep.subr.bf16.mxu0 %v832_v3  ;;  %v94_v14 = vld [vmem:[#allocation2 + $0x190] sm:$0xff]  ;;  %v836_v16 = vpack.c.bf16 %v63_v13, %v62_v11 }
  0x16   :  { %v866_v12 = vpack.c.bf16 %v77_v10, %v76_v9  ;;  %v95_v15 = vld [vmem:[#allocation2 + $0x198] sm:$0xff]  ;;  %865 = vmatprep.subr.bf16.mxu1 %v864_v7  ;;  %v46_v18 = vld [vmem:[#allocation2 + $0x10] sm:$0xff]  ;;  %v64_v23 = vld [vmem:[#allocation2 + $0xa0] sm:$0xff] }
  0x17   :  { %835 = vmatpush3.bf16.msra.mxu0 %v834_v8  ;;  %v868_v17 = vpack.c.bf16 %v95_v15, %v94_v14  ;;  %v47_v19 = vld [vmem:[#allocation2 + $0x18] sm:$0xff]  ;;  %v78_v20 = vld [vmem:[#allocation2 + $0x110] sm:$0xff]  ;;  %v65_v24 = vld [vmem:[#allocation2 + $0xa8] sm:$0xff] }
  0x18   :  { %867 = vmatpush3.bf16.msra.mxu1 %v866_v12  ;;  %v838_v21 = vpack.c.bf16 %v47_v19, %v46_v18  ;;  %v79_v22 = vld [vmem:[#allocation2 + $0x118] sm:$0xff]  ;;  %837 = vmatprep.subr.bf16.mxu0 %v836_v16  ;;  %v840_v26 = vpack.c.bf16 %v65_v24, %v64_v23  ;;  %v96_v27 = vld [vmem:[#allocation2 + $0x1a0] sm:$0xff]  ;;  %v97_v28 = vld [vmem:[#allocation2 + $0x1a8] sm:$0xff] }
  0x19   :  { %869 = vmatprep.subr.bf16.mxu1 %v868_v17  ;;  %v870_v25 = vpack.c.bf16 %v79_v22, %v78_v20  ;;  %v48_v29 = vld [vmem:[#allocation2 + $0x20] sm:$0xff]  ;;  %v872_v30 = vpack.c.bf16 %v97_v28, %v96_v27  ;;  %v49_v31 = vld [vmem:[#allocation2 + $0x28] sm:$0xff]  ;;  %v66_v35 = vld [vmem:[#allocation2 + $0xb0] sm:$0xff] }
  0x1a   :  { %v80_v32 = vld [vmem:[#allocation2 + $0x120] sm:$0xff]  ;;  %v81_v33 = vld [vmem:[#allocation2 + $0x128] sm:$0xff]  ;;  %v842_v34 = vpack.c.bf16 %v49_v31, %v48_v29  ;;  %v67_v36 = vld [vmem:[#allocation2 + $0xb8] sm:$0xff] }
  0x1b   :  { %839 = vmatpush3.bf16.msra.mxu0 %v838_v21  ;;  %v98_v37 = vld [vmem:[#allocation2 + $0x1b0] sm:$0xff]  ;;  %v874_v38 = vpack.c.bf16 %v81_v33, %v80_v32  ;;  %v844_v39 = vpack.c.bf16 %v67_v36, %v66_v35  ;;  %v99_v40 = vld [vmem:[#allocation2 + $0x1b8] sm:$0xff]  ;;  %v68_v46 = vld [vmem:[#allocation2 + $0xc0] sm:$0xff] }
  0x1c   :  { %871 = vmatpush3.bf16.msra.mxu1 %v870_v25  ;;  %841 = vmatprep.subr.bf16.mxu0 %v840_v26  ;;  %v50_v41 = vld [vmem:[#allocation2 + $0x30] sm:$0xff]  ;;  %v51_v42 = vld [vmem:[#allocation2 + $0x38] sm:$0xff]  ;;  %v876_v43 = vpack.c.bf16 %v99_v40, %v98_v37  ;;  %v69_v47 = vld [vmem:[#allocation2 + $0xc8] sm:$0xff] }
  0x1d   :  { %873 = vmatprep.subr.bf16.mxu1 %v872_v30  ;;  %v82_v44 = vld [vmem:[#allocation2 + $0x130] sm:$0xff]  ;;  %v83_v45 = vld [vmem:[#allocation2 + $0x138] sm:$0xff]  ;;  %v100_v48 = vld [vmem:[#allocation2 + $0x1c0] sm:$0xff]  ;;  %v846_v50 = vpack.c.bf16 %v51_v42, %v50_v41  ;;  %v848_v52 = vpack.c.bf16 %v69_v47, %v68_v46 }
  0x1e   :  { %v101_v49 = vld [vmem:[#allocation2 + $0x1c8] sm:$0xff]  ;;  %v878_v51 = vpack.c.bf16 %v83_v45, %v82_v44  ;;  %v52_v53 = vld [vmem:[#allocation2 + $0x40] sm:$0xff]  ;;  %v70_v58 = vld [vmem:[#allocation2 + $0xd0] sm:$0xff] }
  0x1f   :  { %843 = vmatpush3.bf16.msra.mxu0 %v842_v34  ;;  %v53_v54 = vld [vmem:[#allocation2 + $0x48] sm:$0xff]  ;;  %v84_v55 = vld [vmem:[#allocation2 + $0x140] sm:$0xff]  ;;  %v880_v56 = vpack.c.bf16 %v101_v49, %v100_v48  ;;  %v71_v59 = vld [vmem:[#allocation2 + $0xd8] sm:$0xff] }
  0x20   :  { %875 = vmatpush3.bf16.msra.mxu1 %v874_v38  ;;  %845 = vmatprep.subr.bf16.mxu0 %v844_v39  ;;  %v85_v57 = vld [vmem:[#allocation2 + $0x148] sm:$0xff]  ;;  %v102_v60 = vld [vmem:[#allocation2 + $0x1d0] sm:$0xff]  ;;  %v103_v61 = vld [vmem:[#allocation2 + $0x1d8] sm:$0xff]  ;;  %v850_v62 = vpack.c.bf16 %v53_v54, %v52_v53  ;;  %v852_v0 = vpack.c.bf16 %v71_v59, %v70_v58 }
  0x21   :  { %877 = vmatprep.subr.bf16.mxu1 %v876_v43  ;;  %v882_v63 = vpack.c.bf16 %v85_v57, %v84_v55  ;;  %v54_v1 = vld [vmem:[#allocation2 + $0x50] sm:$0xff]  ;;  %v55_v2 = vld [vmem:[#allocation2 + $0x58] sm:$0xff]  ;;  %v884_v4 = vpack.c.bf16 %v103_v61, %v102_v60  ;;  %v72_v6 = vld [vmem:[#allocation2 + $0xe0] sm:$0xff]  ;;  %v970_v60 = vmov 0.0  }
  0x22   :  { %v86_v3 = vld [vmem:[#allocation2 + $0x150] sm:$0xff]  ;;  %v87_v5 = vld [vmem:[#allocation2 + $0x158] sm:$0xff]  ;;  %v73_v7 = vld [vmem:[#allocation2 + $0xe8] sm:$0xff]  ;;  %v854_v10 = vpack.c.bf16 %v55_v2, %v54_v1 }
  0x23   :  { %847 = vmatpush3.bf16.msra.mxu0 %v846_v50  ;;  %v104_v8 = vld [vmem:[#allocation2 + $0x1e0] sm:$0xff]  ;;  %v105_v9 = vld [vmem:[#allocation2 + $0x1e8] sm:$0xff]  ;;  %v886_v13 = vpack.c.bf16 %v87_v5, %v86_v3  ;;  %v856_v14 = vpack.c.bf16 %v73_v7, %v72_v6  ;;  %v40_v17 = vld [vmem:[%s1074_s0 + $0x18] sm:$0xff]  ;;  %v968_v50 = vmov 0.0|0.0  }
  0x24   :  { %879 = vmatpush3.bf16.msra.mxu1 %v878_v51  ;;  %849 = vmatprep.subr.bf16.mxu0 %v848_v52  ;;  %v56_v11 = vld [vmem:[#allocation2 + $0x60] sm:$0xff]  ;;  %v57_v12 = vld [vmem:[#allocation2 + $0x68] sm:$0xff]  ;;  %v888_v18 = vpack.c.bf16 %v105_v9, %v104_v8  ;;  %v74_v20 = vld [vmem:[#allocation2 + $0xf0] sm:$0xff] }
  0x25   :  { %881 = vmatprep.subr.bf16.mxu1 %v880_v56  ;;  %v88_v15 = vld [vmem:[#allocation2 + $0x160] sm:$0xff]  ;;  %v38_v16 = vld [vmem:[%s1074_s0 + $0x8] sm:$0xff]  ;;  %v75_v21 = vld [vmem:[#allocation2 + $0xf8] sm:$0xff]  ;;  %280 = vmatprep.mubr.f32.mxu1 %v40_v17  ;;  %v858_v24 = vpack.c.bf16 %v57_v12, %v56_v11 }
  0x26   :  { %v89_v19 = vld [vmem:[#allocation2 + $0x168] sm:$0xff]  ;;  %210 = vmatprep.mubr.f32.mxu0 %v38_v16  ;;  %v106_v22 = vld [vmem:[#allocation2 + $0x1f0] sm:$0xff]  ;;  %v107_v23 = vld [vmem:[#allocation2 + $0x1f8] sm:$0xff]  ;;  %v860_v26 = vpack.c.bf16 %v75_v21, %v74_v20 }
  0x27   :  { %851 = vmatpush3.bf16.msra.mxu0 %v850_v62  ;;  %v890_v25 = vpack.c.bf16 %v89_v19, %v88_v15  ;;  %v58_v27 = vld [vmem:[#allocation2 + $0x70] sm:$0xff]  ;;  %v59_v28 = vld [vmem:[#allocation2 + $0x78] sm:$0xff]  ;;  %v892_v30 = vpack.c.bf16 %v107_v23, %v106_v22  ;;  %v124_v32 = vld [vmem:[#allocation2 + $0x280] sm:$0xff] }
  0x28   :  { %883 = vmatpush3.bf16.msra.mxu1 %v882_v63  ;;  %853 = vmatprep.subr.bf16.mxu0 %v852_v0  ;;  %v90_v29 = vld [vmem:[#allocation2 + $0x170] sm:$0xff]  ;;  %v91_v31 = vld [vmem:[#allocation2 + $0x178] sm:$0xff]  ;;  %v125_v33 = vld [vmem:[#allocation2 + $0x288] sm:$0xff]  ;;  %v862_v34 = vpack.c.bf16 %v59_v28, %v58_v27 }
  0x29   :  { %885 = vmatprep.subr.bf16.mxu1 %v884_v4  ;;  %v894_v35 = vpack.c.bf16 %v91_v31, %v90_v29  ;;  %v896_v36 = vpack.c.bf16 %v125_v33, %v124_v32  ;;  %v108_v37 = vld [vmem:[#allocation2 + $0x200] sm:$0xff]  ;;  %v109_v38 = vld [vmem:[#allocation2 + $0x208] sm:$0xff]  ;;  %v126_v39 = vld [vmem:[#allocation2 + $0x290] sm:$0xff] }
  0x2a   :  { %v127_v40 = vld [vmem:[#allocation2 + $0x298] sm:$0xff]  ;;  %v37_v41 = vld [vmem:[%s1074_s0] sm:$0xff]  ;;  %v39_v42 = vld [vmem:[%s1074_s0 + $0x10] sm:$0xff]  ;;  %v898_v43 = vpack.c.bf16 %v109_v38, %v108_v37 }
  0x2b   :  { %855 = vmatpush3.bf16.msra.mxu0 %v854_v10  ;;  %v110_v44 = vld [vmem:[#allocation2 + $0x210] sm:$0xff]  ;;  %v900_v45 = vpack.c.bf16 %v127_v40, %v126_v39  ;;  %v111_v46 = vld [vmem:[#allocation2 + $0x218] sm:$0xff]  ;;  %v128_v47 = vld [vmem:[#allocation2 + $0x2a0] sm:$0xff] }
  0x2c   :  { %887 = vmatpush3.bf16.msra.mxu1 %v886_v13  ;;  %857 = vmatprep.subr.bf16.mxu0 %v856_v14  ;;  %v129_v48 = vld [vmem:[#allocation2 + $0x2a8] sm:$0xff]  ;;  %v140_v51 = vld [vmem:[#allocation2 + $0x300] sm:$0xff]  ;;  %v902_v54 = vpack.c.bf16 %v111_v46, %v110_v44  ;;  %v130_v58 = vld [vmem:[#allocation2 + $0x2b0] sm:$0xff] }
  0x2d   :  { %889 = vmatprep.subr.bf16.mxu1 %v888_v18  ;;  %v42_v49 = vld [vmem:[%s1074_s0 + $0x28] sm:$0xff]  ;;  %v904_v55 = vpack.c.bf16 %v129_v48, %v128_v47  ;;  %v112_v56 = vld [vmem:[#allocation2 + $0x220] sm:$0xff]  ;;  %v131_v59 = vld [vmem:[#allocation2 + $0x2b8] sm:$0xff] }
  0x2e   :  { %v141_v52 = vld [vmem:[#allocation2 + $0x308] sm:$0xff]  ;;  %v43_v61 = vld [vmem:[%s1074_s0 + $0x30] sm:$0xff]  ;;  %v908_v63 = vpack.c.bf16 %v131_v59, %v130_v58  ;;  %v115_v1 = vld [vmem:[#allocation2 + $0x238] sm:$0xff] }
  0x2f   :  { %859 = vmatpush3.bf16.msra.mxu0 %v858_v24  ;;  %v929_v53 = vpack.c.bf16 %v141_v52, %v140_v51  ;;  %v113_v57 = vld [vmem:[#allocation2 + $0x228] sm:$0xff]  ;;  %v114_v0 = vld [vmem:[#allocation2 + $0x230] sm:$0xff]  ;;  %v132_v2 = vld [vmem:[#allocation2 + $0x2c0] sm:$0xff] }
  0x30   :  { %891 = vmatpush3.bf16.msra.mxu1 %v890_v25  ;;  %861 = vmatprep.subr.bf16.mxu0 %v860_v26  ;;  %v906_v62 = vpack.c.bf16 %v113_v57, %v112_v56  ;;  %v133_v3 = vld [vmem:[#allocation2 + $0x2c8] sm:$0xff]  ;;  %v910_v4 = vpack.c.bf16 %v115_v1, %v114_v0  ;;  %v116_v6 = vld [vmem:[#allocation2 + $0x240] sm:$0xff]  ;;  %v134_v8 = vld [vmem:[#allocation2 + $0x2d0] sm:$0xff] }
  0x31   :  { %893 = vmatprep.subr.bf16.mxu1 %v892_v30  ;;  %v912_v5 = vpack.c.bf16 %v133_v3, %v132_v2  ;;  %v117_v7 = vld [vmem:[#allocation2 + $0x248] sm:$0xff]  ;;  %v135_v9 = vld [vmem:[#allocation2 + $0x2d8] sm:$0xff]  ;;  %v118_v12 = vld [vmem:[#allocation2 + $0x250] sm:$0xff] }
  0x32   :  { %v914_v10 = vpack.c.bf16 %v117_v7, %v116_v6  ;;  %v916_v11 = vpack.c.bf16 %v135_v9, %v134_v8  ;;  %v119_v13 = vld [vmem:[#allocation2 + $0x258] sm:$0xff]  ;;  %v136_v14 = vld [vmem:[#allocation2 + $0x2e0] sm:$0xff]  ;;  %v137_v15 = vld [vmem:[#allocation2 + $0x2e8] sm:$0xff] }
  0x33   :  { %863 = vmatpush3.bf16.msra.mxu0 %v862_v34  ;;  %v918_v16 = vpack.c.bf16 %v119_v13, %v118_v12  ;;  %v920_v17 = vpack.c.bf16 %v137_v15, %v136_v14  ;;  %v120_v18 = vld [vmem:[#allocation2 + $0x260] sm:$0xff]  ;;  %v121_v19 = vld [vmem:[#allocation2 + $0x268] sm:$0xff]  ;;  %v138_v20 = vld [vmem:[#allocation2 + $0x2f0] sm:$0xff] }
  0x34   :  { %895 = vmatpush3.bf16.msra.mxu1 %v894_v35  ;;  %897 = vmatprep.subr.bf16.mxu0 %v896_v36  ;;  %v139_v21 = vld [vmem:[#allocation2 + $0x2f8] sm:$0xff]  ;;  %v922_v22 = vpack.c.bf16 %v121_v19, %v120_v18  ;;  %v122_v24 = vld [vmem:[#allocation2 + $0x270] sm:$0xff]  ;;  %v41_v27 = vld [vmem:[%s1074_s0 + $0x20] sm:$0xff] }
  0x35   :  { %928 = vmatprep.subr.bf16.mxu1 %v968_v50  ;;  %v924_v23 = vpack.c.bf16 %v139_v21, %v138_v20  ;;  %v123_v25 = vld [vmem:[#allocation2 + $0x278] sm:$0xff]  ;;  %v427_v28 = vld [vmem:[%s1076_s2] sm:$0xf] }
  0x36   :  { %211 = vmatmul.mubr.f32.vlgmr.msra.gmra.mrb[0].mxu0 %v37_v41  ;;  %v926_v26 = vpack.c.bf16 %v123_v25, %v122_v24  ;;  %v507_v44 = vld [vmem:[%s1077_s3] sm:$0xf] }
  0x37   :  { %281 = vmatmul.mubr.f32.vlgmr.msra.gmra.mrb[0].mxu1 %v39_v42  ;;  %899 = vmatpush3.bf16.msra.mxu0 %v898_v43  ;;  %v585_v48 = vld [vmem:[%s1078_s4] sm:$0xf] }
  0x38   :  { %901 = vmatprep.subr.bf16.mxu0 %v900_v45  ;;  %350 = vmatprep.mubr.f32.mxu0 %v42_v49  ;;  %v693_v52 = vld [vmem:[%s1079_s5] ss:$0 sm:$0xff] }
  0x39   :  { %930 = vmatpush3.bf16.msra.mxu1 %v929_v53  ;;  %814 = vmatprep.mubr.msk.f32.mxu1 %vm969_vm0, %v970_v60 }
  0x3a   :  { %817 = vmatprep.subr.mxu1 %v970_v60 }
  0x3b   :  { %903 = vmatpush3.bf16.msra.mxu0 %v902_v54 }
  0x3c   :  { %905 = vmatprep.subr.bf16.mxu0 %v904_v55  ;;  %815 = vmatmul.mubr.msk.f32.vlgmr.msra.gmra.mrb[2].mxu1 %vm142_vm1, %v43_v61 }
  0x3d   :  { %819 = vmatprep.mubr.msk.f32.mxu1 %vm969_vm0, %v970_v60  ;;  %818 = vmatpush3.msk.msra.mxu1 %vm432_vm2, %v427_v28 }
  0x3e   :  { %822 = vmatprep.subr.mxu1 %v970_v60 }
  0x3f   :  { %907 = vmatpush3.bf16.msra.mxu0 %v906_v62 }
  0x40   :  { %909 = vmatprep.subr.bf16.mxu0 %v908_v63 }
  0x43   :  { %911 = vmatpush3.bf16.msra.mxu0 %v910_v4 }
  0x44   :  { %913 = vmatprep.subr.bf16.mxu0 %v912_v5 }
  0x47   :  { %915 = vmatpush3.bf16.msra.mxu0 %v914_v10 }
  0x48   :  { %917 = vmatprep.subr.bf16.mxu0 %v916_v11 }
  0x4b   :  { %919 = vmatpush3.bf16.msra.mxu0 %v918_v16 }
  0x4c   :  { %921 = vmatprep.subr.bf16.mxu0 %v920_v17 }
  0x4f   :  { %923 = vmatpush3.bf16.msra.mxu0 %v922_v22 }
  0x50   :  { %925 = vmatprep.subr.bf16.mxu0 %v924_v23 }
  0x53   :  { %927 = vmatpush3.bf16.msra.mxu0 %v926_v26 }
  0x56   :  { %351 = vmatmul.mubr.f32.vlgmr.msra.gmra.mrb[2].mxu0 %v41_v27 }
 0x109   :  { %v728_v29 = vpop.f32.mrb[0].mxu0 }
 0x10a   :  { %v763_v30 = vpop.f32.mrb[0].mxu1  ;;  %v729_v31 = vpop.f32.mrb[1].mxu0 }
 0x10b   :  { %v730_v32 = vadd.f32 %v729_v31, %v728_v29  ;;  %v764_v33 = vpop.f32.mrb[1].mxu1 }
 0x10c   :  { %v765_v34 = vadd.f32 %v764_v33, %v763_v30 }
 0x10e   :  { %v283_v35 = vadd.f32 %v765_v34, %v730_v32 }
 0x10f   :  { %v422_v36 = vpop.f32.mrb[2].mxu1 }
 0x110   :  { %v816_v37 = vpop.f32.mrb[3].mxu1 }
 0x129   :  { %v798_v38 = vpop.f32.mrb[2].mxu0 }
 0x12a   :  { %v799_v39 = vpop.f32.mrb[3].mxu0 }
 0x12b   :  { %v800_v40 = vadd.f32 %v799_v39, %v798_v38 }
 0x12d   :  { %v353_v41 = vadd.f32 %v800_v40, %v283_v35 }
 0x12f   :  { %v423_v42 = vadd.f32 %v422_v36, %v353_v41 }
 0x131   :  { %v426_v43 = vmax.f32 %v423_v42, 0.0 }
 0x133   :  { %820 = vmatmul.mubr.msk.f32.vlgmr.msra.gmra.mrb[4].mxu1 %vm428_vm3, %v426_v43 }
 0x134   :  { %823 = vmatpush3.msk.msra.mxu1 %vm432_vm2, %v507_v44  ;;  %824 = vmatprep.mubr.msk.f32.mxu1 %vm969_vm0, %v970_v60 }
 0x135   :  { %827 = vmatprep.subr.mxu1 %v970_v60 }
 0x206   :  { %v502_v45 = vpop.f32.mrb[4].mxu1 }
 0x207   :  { %v506_v46 = vmax.f32 %v502_v45, 0.0  ;;  %v821_v47 = vpop.f32.mrb[5].mxu1 }
 0x209   :  { %825 = vmatmul.mubr.msk.f32.vlgmr.msra.gmra.mrb[6].mxu1 %vm428_vm3, %v506_v46 }
 0x20a   :  { %828 = vmatpush3.msk.msra.mxu1 %vm432_vm2, %v585_v48  ;;  %829 = vmatprep.mubr.msk.f32.mxu1 %vm969_vm0, %v970_v60 }
 0x2dc   :  { %v580_v49 = vpop.f32.mrb[6].mxu1 }
 0x2dd   :  { %v584_v50 = vmax.f32 %v580_v49, 0.0  ;;  %v826_v51 = vpop.f32.mrb[7].mxu1 }
 0x2df   :  { %830 = vmatmul.mubr.msk.f32.vlgmr.msra.gmra.mrb[8].mxu1 %vm428_vm3, %v584_v50 }
 0x3b2   :  { %v665_v53 = vpop.f32.mrb[8].mxu1 }
 0x3b3   :  { %v666_v54 = vadd.f32 %v693_v52, %v665_v53  ;;  %v831_v55 = vpop.f32.mrb[9].mxu1 }
 0x3b5   :  { %v670_v56 = vsel %vm669_vm4, %v666_v54, -inf }
 0x3b6   :  { %671 = vmax.xlane.f32.xlu0 %v670_v56 }
 0x443   :  { %v672_v57 = vpop.xlane.xlu0 %671 }
 0x444   :  { %v673_v58 = vsub.f32 %v666_v54, %v672_v57 }
 0x446   :  { %v674_v59 = vmul.f32 1.442695, %v673_v58 }
 0x448   :  { %937 = vpow2.f32 %v674_v59 }
 0x452   :  { %v938_v60 = vpop.eup %937 }
 0x453   :  { %v676_v61 = vsel %vm669_vm4, %v938_v60, 0.0 }
 0x454   :  { %677 = vadd.xlane.f32.xlu0 %v676_v61 }
 0x4e1   :  { %v678_v62 = vpop.xlane.xlu0 %677 }
 0x4e2   :  { %939 = vlog2.f32 %v678_v62 }
 0x4ec   :  { %v940_v63 = vpop.eup %939 }
 0x4ed   :  { %v680_v0 = vmul.f32 0.6931472, %v940_v63 }
 0x4ef   :  { %v681_v1 = vsub.f32 %v673_v58, %v680_v0 }
 0x4f1   :  { %682 = vst.msk [vmem:[%s1080_s6] sm:$0xff] %vm669_vm4, %v681_v1 }
 0x4f2   :  { %687 = vsyncpa [#allocation3], 1 }

</bundles_post_ra>
